<compile_context>
chip_gen: v5e
topology: v5e:2x2
jax: 0.10.0
libtpu: 0.0.40
codegen_flags: <defaults>
</compile_context>

<pallas_src>
import math

import jax
import jax.numpy as jnp
from jax.experimental import pallas as pl
from jax.experimental.pallas import tpu as pltpu


def _round_up(x, m):
    return (x + m - 1) // m * m


def ffn_kernel(x_ref, w1_ref, b1_ref, w2_ref, b2_ref, o_ref, acc_ref):
    """One (TM, D) row tile x one TF-wide slice of d_ff.

    Grid: (M tiles [parallel], F tiles [arbitrary / reduction]).
    acc_ref is a (TM, D) f32 accumulator resident across the F axis.
    """
    f = pl.program_id(1)

    @pl.when(f == 0)
    def _():
        acc_ref[...] = jnp.zeros_like(acc_ref)

    # fc1 slice + bias + ReLU (ReLU is elementwise, so doing it per-F-slice is exact).
    h = jnp.dot(x_ref[...], w1_ref[...], preferred_element_type=jnp.float32)
    h = jnp.maximum(h + b1_ref[...].astype(jnp.float32), 0.0)

    # fc2 partial product, accumulated in f32 on the MXU.
    acc_ref[...] += jnp.dot(h.astype(w2_ref.dtype), w2_ref[...],
                            preferred_element_type=jnp.float32)

    @pl.when(f == pl.num_programs(1) - 1)
    def _():
        o_ref[...] = (acc_ref[...] + b2_ref[...].astype(jnp.float32)).astype(o_ref.dtype)


def position_wise_ffn(x, w1, b1, w2, b2, *, tm=512, tf=1024,
                      vmem_limit_bytes=48 * 1024 * 1024):
    """relu(x @ w1 + b1) @ w2 + b2 over the last dim of x.

    x: (B, S, D); w1: (D, F); b1: (1, F); w2: (F, D); b2: (1, D).
    """
    B, S, D = x.shape
    F = w1.shape[1]
    M = B * S
    x2d = x.reshape(M, D)

    # Row tile: multiple of 8 sublanes, capped at tm; pad M so it divides evenly.
    TM = min(tm, _round_up(M, 8))
    Mp = _round_up(M, TM)
    if Mp != M:
        x2d = jnp.pad(x2d, ((0, Mp - M), (0, 0)))

    # d_ff tile: chunk when it divides cleanly, else keep whole F resident.
    TF = tf if (F > tf and F % tf == 0) else F

    grid = (Mp // TM, F // TF)

    grid_spec = pltpu.PrefetchScalarGridSpec(
        num_scalar_prefetch=0,
        grid=grid,
        in_specs=[
            pl.BlockSpec((TM, D), lambda i, f: (i, 0)),   # x rows (double-buffered)
            pl.BlockSpec((D, TF), lambda i, f: (0, f)),   # w1 slice, resident over M
            pl.BlockSpec((1, TF), lambda i, f: (0, f)),   # b1 slice, resident over M
            pl.BlockSpec((TF, D), lambda i, f: (f, 0)),   # w2 slice, resident over M
            pl.BlockSpec((1, D),  lambda i, f: (0, 0)),   # b2, fully resident
        ],
        out_specs=pl.BlockSpec((TM, D), lambda i, f: (i, 0)),
        scratch_shapes=[pltpu.VMEM((TM, D), jnp.float32)],
    )

    out2d = pl.pallas_call(
        ffn_kernel,
        out_shape=jax.ShapeDtypeStruct((Mp, D), x.dtype),
        grid_spec=grid_spec,
        compiler_params=pltpu.CompilerParams(
            dimension_semantics=("parallel", "arbitrary"),
            vmem_limit_bytes=vmem_limit_bytes,
        ),
    )(x2d, w1, b1, w2, b2)

    return out2d[:M].reshape(B, S, D)


def init_params(key, input_size, d_ff, dtype=jnp.float32):
    """Deterministic init mirroring nn.Linear defaults (uniform +/- 1/sqrt(fan_in))."""
    k1, k2, k3, k4 = jax.random.split(key, 4)
    bound1 = 1.0 / math.sqrt(input_size)
    bound2 = 1.0 / math.sqrt(d_ff)
    # stored as (in, out) = transpose of PyTorch's (out, in)
    w1 = jax.random.uniform(k1, (input_size, d_ff), dtype, -bound1, bound1)
    b1 = jax.random.uniform(k2, (1, d_ff), dtype, -bound1, bound1)
    w2 = jax.random.uniform(k3, (d_ff, input_size), dtype, -bound2, bound2)
    b2 = jax.random.uniform(k4, (1, input_size), dtype, -bound2, bound2)
    return w1, b1, w2, b2


if __name__ == "__main__":
    key = jax.random.PRNGKey(0)
    kx, kp = jax.random.split(key)

    # Small but lane-dense smoke-test shapes (D and F multiples of 128).
    batch, seq, d_model, d_ff = 2, 16, 128, 256
    x = jax.random.normal(kx, (batch, seq, d_model), jnp.float32)
    w1, b1, w2, b2 = init_params(kp, d_model, d_ff)

    # tm=16 / tf=128 force a 2x2 grid so the row tiling, the F-reduction
    # accumulator and the pl.when init/finalize paths are all exercised.
    out = position_wise_ffn(x, w1, b1, w2, b2, tm=16, tf=128)
    out = jax.block_until_ready(out)

    # pure-JAX reference check
    ref = jnp.maximum(x @ w1 + b1[0], 0.0) @ w2 + b2[0]
    assert out.shape == (batch, seq, d_model)
    assert jnp.allclose(out, ref, atol=1e-4, rtol=1e-4), float(jnp.max(jnp.abs(out - ref)))

    print("KERNEL_OK")
</pallas_src>

<mosaic_0001>
module attributes {stable_mosaic.version = 11 : i64} {
  func.func @ffn_kernel(%arg0: i32, %arg1: i32, %arg2: memref<16x128xf32, #tpu.memory_space<vmem>>, %arg3: memref<128x128xf32, #tpu.memory_space<vmem>>, %arg4: memref<1x128xf32, #tpu.memory_space<vmem>>, %arg5: memref<128x128xf32, #tpu.memory_space<vmem>>, %arg6: memref<1x128xf32, #tpu.memory_space<vmem>>, %arg7: memref<16x128xf32, #tpu.memory_space<vmem>>, %arg8: memref<16x128xf32, #tpu.memory_space<vmem>>) attributes {dimension_semantics = [#tpu.dimension_semantics<parallel>, #tpu.dimension_semantics<arbitrary>], iteration_bounds = array<i64: 2, 2>, scalar_prefetch = 0 : i64, scratch_operands = 1 : i64, tpu.core_type = #tpu.core_type<tc>, window_params = [{transform_indices = @transform_0, window_bounds = array<i64: 16, 128>}, {transform_indices = @transform_1, window_bounds = array<i64: 128, 128>}, {transform_indices = @transform_2, window_bounds = array<i64: 1, 128>}, {transform_indices = @transform_3, window_bounds = array<i64: 128, 128>}, {pipeline_mode = #tpu.pipeline_mode<synchronous>, transform_indices = @transform_4, window_bounds = array<i64: 1, 128>}, {transform_indices = @transform_5, window_bounds = array<i64: 16, 128>}]} {
    %c0_i32 = arith.constant 0 : i32
    %0 = arith.cmpi eq, %arg1, %c0_i32 : i32
    %1 = arith.extui %0 : i1 to i32
    %c0_i32_0 = arith.constant 0 : i32
    %2 = arith.cmpi ne, %1, %c0_i32_0 : i32
    scf.if %2 {
      %cst_15 = arith.constant 0.000000e+00 : f32
      %19 = vector.broadcast %cst_15 : f32 to vector<16x128xf32>
      %c0_16 = arith.constant 0 : index
      %c0_17 = arith.constant 0 : index
      %20 = vector.load %arg8[%c0_16, %c0_17] : memref<16x128xf32, #tpu.memory_space<vmem>>, vector<16x128xf32>
      tpu.vector_store %arg8[%c0_16, %c0_17], %19 {strides = array<i32>} : memref<16x128xf32, #tpu.memory_space<vmem>>, vector<16x128xf32>,
    } else {
    }
    %c0 = arith.constant 0 : index
    %c0_1 = arith.constant 0 : index
    %3 = vector.load %arg2[%c0, %c0_1] : memref<16x128xf32, #tpu.memory_space<vmem>>, vector<16x128xf32>
    %c0_2 = arith.constant 0 : index
    %c0_3 = arith.constant 0 : index
    %4 = vector.load %arg3[%c0_2, %c0_3] : memref<128x128xf32, #tpu.memory_space<vmem>>, vector<128x128xf32>
    %cst = arith.constant dense<0.000000e+00> : vector<16x128xf32>
    %5 = tpu.matmul %3, %4, %cst {dimension_numbers = #tpu.dot_dimension_numbers<[1], [0], [0], [1], [0, 0, 1, 1], [], []>} : vector<16x128xf32>, vector<128x128xf32>, vector<16x128xf32> -> vector<16x128xf32>
    %c0_4 = arith.constant 0 : index
    %c0_5 = arith.constant 0 : index
    %6 = vector.load %arg4[%c0_4, %c0_5] : memref<1x128xf32, #tpu.memory_space<vmem>>, vector<1x128xf32>
    %7 = vector.broadcast %6 : vector<1x128xf32> to vector<16x128xf32>
    %8 = arith.addf %5, %7 : vector<16x128xf32>
    %cst_6 = arith.constant 0.000000e+00 : f32
    %9 = vector.broadcast %cst_6 : f32 to vector<16x128xf32>
    %10 = arith.maximumf %8, %9 : vector<16x128xf32>
    %c0_7 = arith.constant 0 : index
    %c0_8 = arith.constant 0 : index
    %11 = vector.load %arg8[%c0_7, %c0_8] : memref<16x128xf32, #tpu.memory_space<vmem>>, vector<16x128xf32>
    %c0_9 = arith.constant 0 : index
    %c0_10 = arith.constant 0 : index
    %12 = vector.load %arg5[%c0_9, %c0_10] : memref<128x128xf32, #tpu.memory_space<vmem>>, vector<128x128xf32>
    %cst_11 = arith.constant dense<0.000000e+00> : vector<16x128xf32>
    %13 = tpu.matmul %10, %12, %cst_11 {dimension_numbers = #tpu.dot_dimension_numbers<[1], [0], [0], [1], [0, 0, 1, 1], [], []>} : vector<16x128xf32>, vector<128x128xf32>, vector<16x128xf32> -> vector<16x128xf32>
    %14 = arith.addf %11, %13 : vector<16x128xf32>
    %c0_12 = arith.constant 0 : index
    %c0_13 = arith.constant 0 : index
    %15 = vector.load %arg8[%c0_12, %c0_13] : memref<16x128xf32, #tpu.memory_space<vmem>>, vector<16x128xf32>
    tpu.vector_store %arg8[%c0_12, %c0_13], %14 {strides = array<i32>} : memref<16x128xf32, #tpu.memory_space<vmem>>, vector<16x128xf32>,
    %c1_i32 = arith.constant 1 : i32
    %16 = arith.cmpi eq, %arg1, %c1_i32 : i32
    %17 = arith.extui %16 : i1 to i32
    %c0_i32_14 = arith.constant 0 : i32
    %18 = arith.cmpi ne, %17, %c0_i32_14 : i32
    scf.if %18 {
      %c0_15 = arith.constant 0 : index
      %c0_16 = arith.constant 0 : index
      %19 = vector.load %arg8[%c0_15, %c0_16] : memref<16x128xf32, #tpu.memory_space<vmem>>, vector<16x128xf32>
      %c0_17 = arith.constant 0 : index
      %c0_18 = arith.constant 0 : index
      %20 = vector.load %arg6[%c0_17, %c0_18] : memref<1x128xf32, #tpu.memory_space<vmem>>, vector<1x128xf32>
      %21 = vector.broadcast %20 : vector<1x128xf32> to vector<16x128xf32>
      %22 = arith.addf %19, %21 : vector<16x128xf32>
      %c0_19 = arith.constant 0 : index
      %c0_20 = arith.constant 0 : index
      %23 = vector.load %arg7[%c0_19, %c0_20] : memref<16x128xf32, #tpu.memory_space<vmem>>, vector<16x128xf32>
      tpu.vector_store %arg7[%c0_19, %c0_20], %22 {strides = array<i32>} : memref<16x128xf32, #tpu.memory_space<vmem>>, vector<16x128xf32>,
    } else {
    }
    return
  }
  func.func @transform_0(%arg0: i32, %arg1: i32) -> (i32, i32) {
    %c0_i32 = arith.constant 0 : i32
    %c0_i32_0 = arith.constant 0 : i32
    return %arg0, %c0_i32 : i32, i32
  }
  func.func @transform_1(%arg0: i32, %arg1: i32) -> (i32, i32) {
    %c0_i32 = arith.constant 0 : i32
    %c0_i32_0 = arith.constant 0 : i32
    return %c0_i32, %arg1 : i32, i32
  }
  func.func @transform_2(%arg0: i32, %arg1: i32) -> (i32, i32) {
    %c0_i32 = arith.constant 0 : i32
    %c0_i32_0 = arith.constant 0 : i32
    return %c0_i32, %arg1 : i32, i32
  }
  func.func @transform_3(%arg0: i32, %arg1: i32) -> (i32, i32) {
    %c0_i32 = arith.constant 0 : i32
    %c0_i32_0 = arith.constant 0 : i32
    return %arg1, %c0_i32 : i32, i32
  }
  func.func @transform_4(%arg0: i32, %arg1: i32) -> (i32, i32) {
    %c0_i32 = arith.constant 0 : i32
    %c0_i32_0 = arith.constant 0 : i32
    %c0_i32_1 = arith.constant 0 : i32
    return %c0_i32, %c0_i32_0 : i32, i32
  }
  func.func @transform_5(%arg0: i32, %arg1: i32) -> (i32, i32) {
    %c0_i32 = arith.constant 0 : i32
    %c0_i32_0 = arith.constant 0 : i32
    return %arg0, %c0_i32 : i32, i32
  }
}

</mosaic_0001>

<bundles_post_ra>
// kernel: tpu_custom_call.1
= control target key start
LH: loop header
LB: loop body
LE: loop exit
PB: predicated region body
PF: predicated region fallthrough
CT: control target
= control target key end

     0   :  { %s1444_s0 = inlined_call_operand.hbm [shape: f32[32,128], index: 0, kind: input, shape index: {}]   ;;  %s1445_s1 = inlined_call_operand.hbm [shape: f32[128,256], index: 1, kind: input, shape index: {}]   ;;  %s1446_s2 = inlined_call_operand.hbm [shape: f32[1,256], index: 2, kind: input, shape index: {}]   ;;  %s1447_s3 = inlined_call_operand.hbm [shape: f32[256,128], index: 3, kind: input, shape index: {}]   ;;  %s1448_s4 = inlined_call_operand.vmem [shape: f32[1,128], index: 4, kind: input, shape index: {}]   ;;  %s1449_s5 = inlined_call_operand.hbm [shape: f32[32,128], index: 5, kind: output, shape index: {}]  }
   0x1   :  { %1466 = sst [smem:[#allocation27_spill]] %s1444_s0 }
   0x2   :  { %1467 = sst [smem:[#allocation28_spill]] %s1445_s1 }
   0x3   :  { %1468 = sst [smem:[#allocation29_spill]] %s1446_s2 }
   0x4   :  { %1469 = sst [smem:[#allocation30_spill]] %s1449_s5 }
   0x5   :  { %10 = vsyncpa [#allocation4], 0 }
   0x6   :  { %12 = vsyncpa [#allocation4 + $0x1], 0 }
   0x7   :  { %13 = vsyncpa [#allocation7], 0 }
   0x8   :  { %15 = vsyncpa [#allocation7 + $0x1], 0 }
   0x9   :  { %16 = vsyncpa [#allocation10], 0 }
   0xa   :  { %18 = vsyncpa [#allocation10 + $0x1], 0 }
   0xb   :  { %19 = vsyncpa [#allocation5], 0 }
   0xc   :  { %21 = vsyncpa [#allocation5 + $0x1], 0  ;;  %s1121_s18 = smov 0   ;;  %s1123_s19 = smov 0  }
   0xd   :  { %s1125_s20 = smov 0   ;;  %s1127_s21 = smov 0  }
   0xe   :  { %s1129_s22 = smov 0   ;;  %s1131_s23 = smov 0  }
   0xf   :  { %s1133_s24 = smov 0   ;;  %s1135_s25 = smov 0  }
  0x10   :  { %s1137_s26 = smov 0   ;;  %s1139_s27 = smov 0  }
  0x11   :  { %s1141_s28 = smov 0  }
  0x12 LB: > { %1470 = sst [smem:[#allocation16_spill]] %s1051_s20  ;;  %p54_p0 = scmp.eq.s32.totalorder %s1083_s28, 0  ;;  %s1083_s28 = sphi %s1141_s28, %s27_s28   ;;  %s1079_s27 = sphi %s1139_s27, %s1507_s27   ;;  %s1075_s26 = sphi %s1137_s26, %s1514_s26   ;;  %s1071_s25 = sphi %s1135_s25, %s1513_s25   ;;  %s1067_s24 = sphi %s1133_s24, %s1512_s24   ;;  %s1063_s23 = sphi %s1131_s23, %s1504_s23   ;;  %s1059_s22 = sphi %s1129_s22, %s1511_s22   ;;  %s1055_s21 = sphi %s1127_s21, %s1510_s21   ;;  %s1051_s20 = sphi %s1125_s20, %s1502_s20   ;;  %s1047_s19 = sphi %s1123_s19, %s1509_s19   ;;  %s1043_s18 = sphi %s1121_s18, %s1508_s18  }
  0x13   : > { %1471 = sst [smem:[#allocation17_spill]] %s1055_s21  ;;  %p79_p1 = scmp.ne.s32.totalorder %s1051_s20, %s1047_s19 }
  0x14   : > { %1472 = sst [smem:[#allocation18_spill]] %s1063_s23  ;;  %p85_p2 = scmp.ne.s32.totalorder %s1047_s19, %s1043_s18 }
  0x15   : > { %1473 = sst [smem:[#allocation19_spill]] %s1071_s25  ;;  %p1456_p3 = scmp.lt.s32.totalorder %s1083_s28, 4 }
  0x16   : > { %1474 = sst [smem:[#allocation20_spill]] %s1079_s27  ;;  %p81_p4 = por %p79_p1, %p54_p0 }
  0x17   : > { %1475 = sst [smem:[#allocation21_spill]] %s1083_s28  ;;  %s233_s30 = sand.u32 1, %s1083_s28  }
  0x18   : > { %s1187_s6 = sand.u32 1, %s1051_s20   ;;  %s657_s8 = sshll.u32 %s1075_s26, 3 }
  0x19   : > { %s1450_s7 = sshll.u32 %s1187_s6, 7  ;;  %s1476_s1 = sld [smem:[#allocation28_spill]] }
  0x1a   : > { %s237_s13 = scalar_lea.vmem [#allocation6], %s1450_s7  ;;  %p1198_p5 = pnand %p1456_p3, %p81_p4 }
  0x1b   : > { %s244_s14 = sshll.u32 %s237_s13, 4  ;;  %p661_p6 = scmp.ge.s32.totalorder %s1083_s28, 1  ;;  %s245_s14 = int_to_ptr.vmem [resolvable:$true] %s244_s14 }
  0x1c   : > { %p291_p7 = scmp.lt.s32.totalorder %s1083_s28, 5  ;;  %s1204_s16 = scalar_lea.sflag [#allocation7], %s233_s30 }
  0x1d   : > { %s1085_s17 = smov 256   ;;  %s1453_s9 = smov 8  }
  0x1e   : > { %p1211_p8 = pnand %p661_p6, %p291_p7  ;;  %s1216_s30 = sadd.s32 4294967295, %s1083_s28  }
  0x1f   : > { %s241_s11 = scalar_lea.hbm %s1476_s1, %s657_s8  ;;  %s1451_s8 = smov 128  }
  0x20   : > { %s242_s12 = sshll.u32 %s241_s11, 4  ;;  %s650_s11 = sadd.s32 4294967294, %s1083_s28   ;;  %s243_s12 = int_to_ptr.hbm [resolvable:$true] %s242_s12 }
  0x21   : > { %724 = dma.hbm_to_vmem [thread:$0]  (!%p1198_p5), %s243_s12, 2048, %s245_s14, %s1204_s16, %s1085_s17, %s1451_s8, %s1453_s9  }
  0x22   : > { %s36_s13 = sadd.s32 1, %s1075_s26  ;;  %s39_s7 = sadd.s32 1, %s1079_s27 }
  0x23   : > { %p37_p9 = scmp.ge.s32.totalorder %s36_s13, 2  ;;  %s46_s29 = sadd.s32 1, %s1063_s23 }
  0x24   : > { %p53_p10 = scmp.ne.s32.totalorder %s1063_s23, %s1059_s22  ;;  %p59_p11 = scmp.ne.s32.totalorder %s1059_s22, %s1055_s21 }
  0x25   : > { %s1516_s13 = smov (%p37_p9, %s36_s13), 0  ;;  %s1518_s7 = smov (!%p37_p9, %s39_s7), %s1079_s27 }
  0x26   : > { %1479 = sst [smem:[#allocation22_spill]] %s1516_s13  ;;  %p1234_p12 = por %p54_p0, %p53_p10 }
  0x27   : > { %p60_p13 = scmp.eq.s32.totalorder %s1216_s30, 0  ;;  %p41_p1 = scmp.ge.s32.totalorder %s1518_s7, 2 }
  0x28   : > { %s69_s14 = ssub.s32 %s1075_s26, %s1516_s13  ;;  %s1483_s8 = sadd.s32 1, %s1051_s20 }
  0x29   : > { %p1244_p4 = por %p60_p13, %p59_p11  ;;  %p70_p6 = scmp.eq.s32.totalorder %s69_s14, 0 }
  0x2a   : > { %s1520_s7 = smov (%p41_p1, %s1518_s7), 0  ;;  %p1260_p0 = por %p85_p2, %p60_p13 }
  0x2b   : > { %1482 = sst [smem:[#allocation23_spill]] %s1520_s7  ;;  %s43_s1 = ssub.s32 %s1079_s27, %s1520_s7 }
  0x2c   : > { %s1253_s9 = scalar_select %p70_p6, %s1051_s20, %s1483_s8  }
  0x2d   : > { %p44_p7 = scmp.eq.s32.totalorder %s43_s1, 0  ;;  %p182_p9 = scmp.eq.s32.totalorder %s1216_s30, 3 }
  0x2e   : > { %1484 = sst [smem:[#allocation24_spill]] %s1253_s9  ;;  %p188_p3 = scmp.eq.s32.totalorder %s650_s11, 3 }
  0x2f   : > { %s211_s13 = sand.u32 1, %s1063_s23   ;;  %p1272_p1 = por %p182_p9, %p53_p10 }
  0x30   : > { %s1267_s14 = scalar_select %p44_p7, %s1063_s23, %s46_s29  }
  0x31   : > { %p1279_p2 = por %p188_p3, %p59_p11  ;;  %s653_s8 = sshll.u32 %s211_s13, 4 }
  0x32   : > { %1486 = sst [smem:[#allocation25_spill]] %s1267_s14  ;;  %s673_s7 = sshll.u32 %s1079_s27, 4 }
  0x33   : > { %s1488_s18 = scalar_select %p1279_p2, 1, 0 }
  0x34   : > { %s1490_s0 = sld [smem:[#allocation27_spill]]  ;;  %s215_s11 = scalar_lea.vmem [#allocation3], %s653_s8 }
  0x35   : > { %1489 = sst [smem:[#allocation26_spill]] %s1488_s18  ;;  %s223_s14 = sshll.u32 %s215_s11, 4  ;;  %s224_s14 = int_to_ptr.vmem [resolvable:$true] %s223_s14 }
  0x36   : > { %p1491_p3 = scmp.lt.s32.totalorder %s1083_s28, 4  ;;  %s1492_s2 = sld [smem:[#allocation29_spill]] }
  0x37   : > { %s212_s9 = scalar_lea.sflag [#allocation4], %s211_s13  ;;  %s1493_s1 = smov 8  }
  0x38   : > { %p719_p10 = pnand %p1491_p3, %p1234_p12  ;;  %s257_s8 = scalar_lea.vmem [#allocation8], %s1187_s6 }
  0x39   : > { %s674_s12 = sshll.u32 %s1075_s26, 7  ;;  %s1495_s18 = sshll.u32 %s1187_s6, 7 }
  0x3a   : > { %s220_s29 = scalar_lea.hbm %s1490_s0, %s673_s7  ;;  %s1494_s7 = smov 128  }
  0x3b   : > { %s221_s23 = sshll.u32 %s220_s29, 4  ;;  %s264_s29 = sshll.u32 %s257_s8, 4  ;;  %s222_s23 = int_to_ptr.hbm [resolvable:$true] %s221_s23  ;;  %s265_s29 = int_to_ptr.vmem [resolvable:$true] %s264_s29 }
  0x3c   : > { %s260_s27 = scalar_lea.hbm %s1492_s2, %s1075_s26  ;;  %s280_s20 = scalar_lea.hbm %s1447_s3, %s674_s12 }
  0x3d   : > { %s262_s21 = sshll.u32 %s260_s27, 4  ;;  %s275_s2 = scalar_lea.vmem [#allocation9], %s1495_s18  ;;  %s263_s21 = int_to_ptr.hbm [resolvable:$true] %s262_s21 }
  0x3e   : > { %721 = dma.hbm_to_vmem [thread:$0]  (!%p719_p10), %s222_s23, 256, %s224_s14, %s212_s9, %s1494_s7, %s1494_s7, %s1493_s1  }
  0x3f   : > { %727 = dma.hbm_to_vmem [thread:$0]  (!%p1198_p5), %s263_s21, 16, %s265_s29, %s1204_s16  }
  0x40   : > { %s283_s27 = sshll.u32 %s275_s2, 4  ;;  %s281_s28 = sshll.u32 %s280_s20, 4  ;;  %s284_s27 = int_to_ptr.vmem [resolvable:$true] %s283_s27  ;;  %s282_s28 = int_to_ptr.hbm [resolvable:$true] %s281_s28 }
  0x41   : > { %s272_s13 = scalar_lea.sflag [#allocation10], %s1187_s6  ;;  %295 = sbr.rel (%p1211_p8) target bundleno = 423 (0x1a7), region = 40 }
  0x42   : > { %730 = dma.hbm_to_vmem [thread:$0]  (!%p1198_p5), %s282_s28, 2048, %s284_s27, %s272_s13, %s1494_s7, %s1494_s7, %s1493_s1  }
  0x43   : > { %s1317_s21 = sand.u32 (!%p1211_p8), 1, %s1059_s22  }
  0x44   : > { %s662_s0 = sshll.u32 (!%p1211_p8), %s1317_s21, 4  ;;  %s298_s2 = scalar_lea.sflag (!%p1211_p8), [#allocation4], %s1317_s21 }
  0x45   : > { %s1321_s23 = scalar_lea.vmem (!%p1211_p8), [#allocation3], %s662_s0 }
  0x46   : > { %1026 = dma.done.wait (%p1244_p4), %s298_s2, 256  }
  0x47   : > { %1028 = vsyncadd (%p1244_p4), %s298_s2, 4294967040  ;;  %s307_s28 = sand.u32 1, %s1216_s30   ;;  %s1329_s6 = sand.u32 1, %s1047_s19  }
  0x48   : > { %s663_s15 = sshll.u32 %s1329_s6, 7  ;;  %s308_s16 = scalar_lea.sflag [#allocation7], %s307_s28 }
  0x49   : > { %s1332_s10 = scalar_lea.vmem [#allocation6], %s663_s15 }
  0x4a   : > { %1030 = dma.done.wait (%p1260_p0), %s308_s16, 2064  }
  0x4b   : > { %1032 = vsyncadd (%p1260_p0), %s308_s16, 4294965232  ;;  %s320_s17 = scalar_lea.vmem [#allocation8], %s1329_s6  ;;  %s327_s14 = scalar_lea.sflag [#allocation10], %s1329_s6 }
  0x4c   : > { %s1340_s9 = scalar_lea.vmem [#allocation9], %s663_s15 }
  0x4d   : > { %1034 = dma.done.wait (%p1260_p0), %s327_s14, 2048  }
  0x4e   : > { %1036 = vsyncadd (%p1260_p0), %s327_s14, 4294965248  ;;  %s1346_s30 = scalar_lea.vmem [#allocation11], %s662_s0  ;;  %p666_p5 = scmp.ne.s32.totalorder %s1067_s24, 0 }
  0x50   : > { %378 = sbr.rel (%p666_p5) target bundleno = 88 (0x58), region = 60 }
  0x55   : > { %v1088_v0 = vmov 0.0  }
  0x56   : > { %379 = vst [vmem:[#allocation2] sm:$0xff] %v1088_v0 }
  0x57   : > { %380 = vst [vmem:[#allocation2 + $0x8] sm:$0xff] %v1088_v0 }
  0x58 PF: > { %v398_v1 = vld [vmem:[%s1332_s10 + $0x78] sm:$0xff]  ;;  %v397_v2 = vld [vmem:[%s1332_s10 + $0x70] sm:$0xff]  ;;  %v396_v3 = vld [vmem:[%s1332_s10 + $0x68] sm:$0xff]  ;;  %p667_p8 = scmp.ne.s32.totalorder %s1067_s24, 1 }
  0x59   : > { %676 = vmatpush.msra.mxu2 %v398_v1  ;;  %403 = vmatpush.msra.mxu0 %v398_v1  ;;  %v395_v4 = vld [vmem:[%s1332_s10 + $0x60] sm:$0xff]  ;;  %v394_v5 = vld [vmem:[%s1332_s10 + $0x58] sm:$0xff]  ;;  %v393_v8 = vld [vmem:[%s1332_s10 + $0x50] sm:$0xff] }
  0x5a   : > { %v445_v6 = vld [vmem:[%s1340_s9 + $0x78] sm:$0xff]  ;;  %v444_v7 = vld [vmem:[%s1340_s9 + $0x70] sm:$0xff]  ;;  %v443_v9 = vld [vmem:[%s1340_s9 + $0x68] sm:$0xff] }
  0x5b   : > { %677 = vmatpush.msra.mxu2 %v397_v2  ;;  %404 = vmatpush.msra.mxu0 %v397_v2  ;;  %v392_v10 = vld [vmem:[%s1332_s10 + $0x48] sm:$0xff]  ;;  %v391_v12 = vld [vmem:[%s1332_s10 + $0x40] sm:$0xff]  ;;  %v390_v14 = vld [vmem:[%s1332_s10 + $0x38] sm:$0xff] }
  0x5c   : > { %692 = vmatpush.msra.mxu3 %v445_v6  ;;  %446 = vmatpush.msra.mxu1 %v445_v6  ;;  %v442_v11 = vld [vmem:[%s1340_s9 + $0x60] sm:$0xff]  ;;  %v441_v13 = vld [vmem:[%s1340_s9 + $0x58] sm:$0xff]  ;;  %v440_v15 = vld [vmem:[%s1340_s9 + $0x50] sm:$0xff] }
  0x5d   : > { %678 = vmatpush.msra.mxu2 %v396_v3  ;;  %405 = vmatpush.msra.mxu0 %v396_v3  ;;  %v389_v16 = vld [vmem:[%s1332_s10 + $0x30] sm:$0xff]  ;;  %v388_v18 = vld [vmem:[%s1332_s10 + $0x28] sm:$0xff]  ;;  %v387_v20 = vld [vmem:[%s1332_s10 + $0x20] sm:$0xff] }
  0x5e   : > { %693 = vmatpush.msra.mxu3 %v444_v7  ;;  %447 = vmatpush.msra.mxu1 %v444_v7  ;;  %v439_v17 = vld [vmem:[%s1340_s9 + $0x48] sm:$0xff]  ;;  %v438_v19 = vld [vmem:[%s1340_s9 + $0x40] sm:$0xff]  ;;  %v437_v21 = vld [vmem:[%s1340_s9 + $0x38] sm:$0xff] }
  0x5f   : > { %679 = vmatpush.msra.mxu2 %v395_v4  ;;  %406 = vmatpush.msra.mxu0 %v395_v4  ;;  %v386_v22 = vld [vmem:[%s1332_s10 + $0x18] sm:$0xff]  ;;  %v385_v24 = vld [vmem:[%s1332_s10 + $0x10] sm:$0xff]  ;;  %v384_v26 = vld [vmem:[%s1332_s10 + $0x8] sm:$0xff] }
  0x60   : > { %694 = vmatpush.msra.mxu3 %v443_v9  ;;  %448 = vmatpush.msra.mxu1 %v443_v9  ;;  %v436_v23 = vld [vmem:[%s1340_s9 + $0x30] sm:$0xff]  ;;  %v435_v25 = vld [vmem:[%s1340_s9 + $0x28] sm:$0xff]  ;;  %v434_v27 = vld [vmem:[%s1340_s9 + $0x20] sm:$0xff] }
  0x61   : > { %680 = vmatpush.msra.mxu2 %v394_v5  ;;  %407 = vmatpush.msra.mxu0 %v394_v5  ;;  %v383_v28 = vld [vmem:[%s1332_s10] sm:$0xff]  ;;  %v382_v29 = vld [vmem:[%s1321_s23 + $0x8] sm:$0xff]  ;;  %v831_v35 = vld [vmem:[%s320_s17] ss:$0 sm:$0xff] }
  0x62   : > { %695 = vmatpush.msra.mxu3 %v442_v11  ;;  %449 = vmatpush.msra.mxu1 %v442_v11  ;;  %v381_v30 = vld [vmem:[%s1321_s23] sm:$0xff]  ;;  %v429_v45 = vld [vmem:[#allocation2 + $0x8] sm:$0xff] }
  0x63   : > { %681 = vmatpush.msra.mxu2 %v393_v8  ;;  %408 = vmatpush.msra.mxu0 %v393_v8  ;;  %v433_v31 = vld [vmem:[%s1340_s9 + $0x18] sm:$0xff]  ;;  %v432_v32 = vld [vmem:[%s1340_s9 + $0x10] sm:$0xff]  ;;  %v431_v33 = vld [vmem:[%s1340_s9 + $0x8] sm:$0xff] }
  0x64   : > { %696 = vmatpush.msra.mxu3 %v441_v13  ;;  %450 = vmatpush.msra.mxu1 %v441_v13  ;;  %v430_v34 = vld [vmem:[%s1340_s9] sm:$0xff]  ;;  %v428_v42 = vld [vmem:[#allocation2] sm:$0xff] }
  0x65   : > { %682 = vmatpush.msra.mxu2 %v392_v10  ;;  %409 = vmatpush.msra.mxu0 %v392_v10 }
  0x66   : > { %697 = vmatpush.msra.mxu3 %v440_v15  ;;  %451 = vmatpush.msra.mxu1 %v440_v15 }
  0x67   : > { %683 = vmatpush.msra.mxu2 %v391_v12  ;;  %410 = vmatpush.msra.mxu0 %v391_v12 }
  0x68   : > { %698 = vmatpush.msra.mxu3 %v439_v17  ;;  %452 = vmatpush.msra.mxu1 %v439_v17 }
  0x69   : > { %684 = vmatpush.msra.mxu2 %v390_v14  ;;  %411 = vmatpush.msra.mxu0 %v390_v14 }
  0x6a   : > { %699 = vmatpush.msra.mxu3 %v438_v19  ;;  %453 = vmatpush.msra.mxu1 %v438_v19 }
  0x6b   : > { %685 = vmatpush.msra.mxu2 %v389_v16  ;;  %412 = vmatpush.msra.mxu0 %v389_v16 }
  0x6c   : > { %700 = vmatpush.msra.mxu3 %v437_v21  ;;  %454 = vmatpush.msra.mxu1 %v437_v21 }
  0x6d   : > { %686 = vmatpush.msra.mxu2 %v388_v18  ;;  %413 = vmatpush.msra.mxu0 %v388_v18 }
  0x6e   : > { %701 = vmatpush.msra.mxu3 %v436_v23  ;;  %455 = vmatpush.msra.mxu1 %v436_v23 }
  0x6f   : > { %687 = vmatpush.msra.mxu2 %v387_v20  ;;  %414 = vmatpush.msra.mxu0 %v387_v20 }
  0x70   : > { %702 = vmatpush.msra.mxu3 %v435_v25  ;;  %456 = vmatpush.msra.mxu1 %v435_v25 }
  0x71   : > { %688 = vmatpush.msra.mxu2 %v386_v22  ;;  %415 = vmatpush.msra.mxu0 %v386_v22 }
  0x72   : > { %703 = vmatpush.msra.mxu3 %v434_v27  ;;  %457 = vmatpush.msra.mxu1 %v434_v27 }
  0x73   : > { %689 = vmatpush.msra.mxu2 %v385_v24  ;;  %416 = vmatpush.msra.mxu0 %v385_v24 }
  0x74   : > { %704 = vmatpush.msra.mxu3 %v433_v31  ;;  %458 = vmatpush.msra.mxu1 %v433_v31 }
  0x75   : > { %690 = vmatpush.msra.mxu2 %v384_v26  ;;  %417 = vmatpush.msra.mxu0 %v384_v26 }
  0x76   : > { %705 = vmatpush.msra.mxu3 %v432_v32  ;;  %459 = vmatpush.msra.mxu1 %v432_v32 }
  0x77   : > { %691 = vmatpush.msra.mxu2 %v383_v28  ;;  %418 = vmatpush.msra.mxu0 %v383_v28 }
  0x78   : > { %422 = vmatmul.f32.vlgmr.msra.gmra.mxu2 %v382_v29  ;;  %419 = vmatmul.f32.vlgmr.msra.gmra.mxu0 %v381_v30 }
  0x79   : > { %706 = vmatpush.msra.mxu3 %v431_v33  ;;  %460 = vmatpush.msra.mxu1 %v431_v33 }
  0x7b   : > { %707 = vmatpush.msra.mxu3 %v430_v34  ;;  %461 = vmatpush.msra.mxu1 %v430_v34 }
  0xf5   : > { %v420_v36 = vpop.f32.mrf.mxu0 }
  0xf6   : > { %v421_v37 = vadd.f32 %v831_v35, %v420_v36 }
  0xf8   : > { %v426_v38 = vmax.f32 %v421_v37, 0.0 }
  0xfa   : > { %462 = vmatmul.f32.vlgmr.msra.gmra.mxu1 %v426_v38 }
  0xfb   : > { %v423_v39 = vpop.f32.mrf.mxu2 }
  0xfc   : > { %v424_v40 = vadd.f32 %v831_v35, %v423_v39 }
  0xfe   : > { %v427_v41 = vmax.f32 %v424_v40, 0.0 }
 0x100   : > { %465 = vmatmul.f32.vlgmr.msra.gmra.mxu3 %v427_v41 }
 0x177   : > { %v463_v43 = vpop.f32.mrf.mxu1 }
 0x178   : > { %v469_v44 = vadd.f32 %v463_v43, %v428_v42 }
 0x17a   : > { %471 = vst [vmem:[#allocation2] sm:$0xff] %v469_v44 }
 0x182   : > { %476 = sbr.rel (%p667_p8) target bundleno = 401 (0x191), region = 64 }
 0x183   : > { %v466_v46 = vpop.f32.mrf.mxu3 }
 0x184   : > { %v470_v47 = vadd.f32 %v466_v46, %v429_v45 }
 0x186   : > { %472 = vst [vmem:[#allocation2 + $0x8] sm:$0xff] %v470_v47 }
 0x187   : > { %v477_v48 = vld [vmem:[#allocation2] sm:$0xff] }
 0x188   : > { %v832_v49 = vld [vmem:[%s1448_s4] ss:$0 sm:$0xff] }
 0x189   : > { %v483_v51 = vadd.f32 %v832_v49, %v477_v48 }
 0x18b   : > { %485 = vst [vmem:[%s1346_s30] sm:$0xff] %v483_v51 }
 0x18d   : > { %v478_v50 = vld [vmem:[#allocation2 + $0x8] sm:$0xff] }
 0x18e   : > { %v484_v52 = vadd.f32 %v832_v49, %v478_v50 }
 0x190   : > { %486 = vst [vmem:[%s1346_s30 + $0x8] sm:$0xff] %v484_v52 }
 0x191 PF: > { %s1496_s7 = sld [smem:[#allocation19_spill]]  ;;  %s500_s20 = sshll.u32 %s1346_s30, 4  ;;  %s501_s20 = int_to_ptr.vmem [resolvable:$true] %s500_s20 }
 0x192   : > { %s1497_s12 = sld [smem:[#allocation30_spill]]  ;;  %s488_s27 = scalar_lea.sflag [#allocation5], %s1317_s21 }
 0x197   : > { %s675_s8 = sshll.u32 %s1496_s7, 4 }
 0x198   : > { %s499_s11 = scalar_lea.hbm %s1497_s12, %s675_s8  ;;  %s973_s28 = scalar_lea.hbm %s1497_s12, 32 }
 0x199   : > { %s502_s18 = sshll.u32 %s499_s11, 4  ;;  %s503_s18 = int_to_ptr.hbm [resolvable:$true] %s502_s18 }
 0x19a   : > { %s967_s13 = sshra.s32 %s503_s18, 4  ;;  %s968_s13 = int_to_ptr.hbm [resolvable:$true] %s967_s13 }
 0x19b   : > { %s969_s0 = scalar_lea.hbm %s968_s13, 16  ;;  %p974_p4 = scmp.lt.s32.totalorder %s968_s13, %s1497_s12 }
 0x19c   : > { %p970_p11 = scmp.ne.s32.totalorder %s968_s13, %s969_s0  ;;  %p975_p6 = scmp.lt.s32.totalorder %s973_s28, %s969_s0 }
 0x19e   : > { %p971_p12 = pnand %p970_p11, %p1272_p1  ;;  %p976_p0 = por %p975_p6, %p974_p4 }
 0x1a0   : > { %p972_p13 = pneg %p971_p12 }
 0x1a2   : > { %p977_p7 = pnand %p976_p0, %p972_p13 }
 0x1a4   : > { %980 = shalt.err (!%p977_p7)
}
 0x1a5   : > { %s1089_s21 = smov 128   ;;  %s1090_s16 = smov 8  }
 0x1a6   : > { %716 = dma.vmem_to_hbm [thread:$0]  (%p1272_p1), %s501_s20, 256, %s503_s18, %s488_s27, %s1089_s21, %s1089_s21, %s1090_s16  }
 0x1a7 PF: > { %s1498_s10 = sld [smem:[#allocation21_spill]] }
 0x1a8   : > { %s1499_s17 = sld [smem:[#allocation17_spill]] }
 0x1ad   : > { %p736_p9 = scmp.ge.s32.totalorder %s1498_s10, 2 }
 0x1ae   : > { %s517_s9 = sand.u32 1, %s1499_s17  }
 0x1af   : > { %p732_p3 = pnand %p736_p9, %p1279_p2  ;;  %s518_s30 = scalar_lea.sflag [#allocation5], %s517_s9 }
 0x1b1   : > { %p733_p10 = pneg %p732_p3 }
 0x1b3   : > { %1038 = dma.done.wait (%p733_p10), %s518_s30, 256  }
 0x1b4   : > { %1040 = vsyncadd (%p733_p10), %s518_s30, 4294967040  ;;  %s27_s28 = sadd.s32 1, %s1498_s10   ;;  %s1501_s5 = sld [smem:[#allocation16_spill]] }
 0x1b5   : > { %p24_p5 = scmp.ge.s32.totalorder %s27_s28, 6   ;;  %s1502_s20 = sld [smem:[#allocation24_spill]] }
 0x1b6   : > { %s1503_s25 = sld [smem:[#allocation18_spill]]  ;;  %s1508_s18 = smov %s1047_s19 }
 0x1b7   : > { %s1504_s23 = sld [smem:[#allocation25_spill]]  ;;  %s1510_s21 = smov %s1059_s22 }
 0x1b8   : > { %s1505_s1 = sld [smem:[#allocation20_spill]]  ;;  %s1512_s24 = smov %s1075_s26 }
 0x1b9   : > { %s1506_s7 = sld [smem:[#allocation22_spill]] }
 0x1ba   : > { %s1507_s27 = sld [smem:[#allocation23_spill]]  ;;  %s1509_s19 = smov %s1501_s5 }
 0x1bb   :  { %26 = sbr.rel (!%p24_p5) target bundleno = 18 (0x12), region = 130 }
 0x1bc   : > { %s1511_s22 = smov %s1503_s25 }
 0x1be   : > { %s1513_s25 = smov %s1505_s1 }
 0x1bf   : > { %s1514_s26 = smov %s1506_s7 }
 0x1c0   :  { %524 = vsyncpa [#allocation4], 1 }
 0x1c1   :  { %526 = vsyncpa [#allocation4 + $0x1], 1 }
 0x1c2   :  { %527 = vsyncpa [#allocation7], 1 }
 0x1c3   :  { %529 = vsyncpa [#allocation7 + $0x1], 1 }
 0x1c4   :  { %530 = vsyncpa [#allocation10], 1 }
 0x1c5   :  { %532 = vsyncpa [#allocation10 + $0x1], 1 }
 0x1c6   :  { %533 = vsyncpa [#allocation5], 1 }
 0x1c7   :  { %535 = vsyncpa [#allocation5 + $0x1], 1 }

</bundles_post_ra>
